<compile_context>
chip_gen: v5e
topology: v5e:2x2
jax: 0.10.0
libtpu: 0.0.40
codegen_flags: <defaults>
</compile_context>

<pallas_src>
import functools

import jax
import jax.numpy as jnp
from jax.experimental import pallas as pl
from jax.experimental.pallas import tpu as pltpu


def _round_up(v, m):
    return (v + m - 1) // m * m


def _fsmn_kernel(*refs, T, lorder, rorder, lstride, rstride, la, right_pad,
                 has_right):
    # refs = (x_ref, wl_ref, [wr_ref,] out_ref, xs_ref)
    if has_right:
        x_ref, wl_ref, wr_ref, out_ref, xs_ref = refs
    else:
        x_ref, wl_ref, out_ref, xs_ref = refs
        wr_ref = None

    td = out_ref.shape[-1]

    # Build the zero-padded time window in VMEM scratch:
    #   xs[0:la]          = 0   (left zero pad; la = left_pad rounded up to 8)
    #   xs[la:la+T]       = x   (8-aligned, lane-dense store)
    #   xs[la+T:la+T+rp]  = 0   (right zero pad)
    if la > 0:
        xs_ref[0:la, :] = jnp.zeros((la, td), dtype=xs_ref.dtype)
    xs_ref[la:la + T, :] = x_ref[0]
    if right_pad > 0:
        xs_ref[la + T:la + T + right_pad, :] = jnp.zeros(
            (right_pad, td), dtype=xs_ref.dtype)

    # Hoist weight loads out of the tap loops.
    wl = wl_ref[...].astype(jnp.float32)                      # (lorder, td)

    # Identity path fused into the k = lorder-1 causal tap (shift 0):
    # both read xs[la:la+T].
    center = xs_ref[la:la + T, :].astype(jnp.float32)
    acc = (1.0 + wl[lorder - 1][None, :]) * center

    # Remaining causal taps: x[t - (lorder-1-k)*lstride] -> xs[la - (lorder-1-k)*lstride + t]
    for k in range(lorder - 1):
        off = la - (lorder - 1 - k) * lstride
        acc = acc + wl[k][None, :] * xs_ref[off:off + T, :].astype(jnp.float32)

    # Anti-causal taps: x[t + (k+1)*rstride] -> xs[la + (k+1)*rstride + t]
    if has_right:
        wr = wr_ref[...].astype(jnp.float32)                  # (rorder, td)
        for k in range(rorder):
            off = la + (k + 1) * rstride
            acc = acc + wr[k][None, :] * xs_ref[off:off + T, :].astype(jnp.float32)

    out_ref[0] = acc.astype(out_ref.dtype)


def fsmn_forward(x, wl, wr, *, lstride, rstride):
    """FSMN memory block forward.

    x:  (B, T, D)
    wl: (lorder, D)  -- conv_left.weight[d, 0, k, 0] laid out as (k, d)
    wr: (rorder, D)  -- conv_right.weight[d, 0, k, 0] laid out as (k, d); rorder may be 0
    """
    B, T, D = x.shape
    lorder = wl.shape[0]
    rorder = 0 if wr is None else wr.shape[0]
    has_right = rorder > 0

    # Lane-dense layout: pad the channel dim up to a multiple of 128 when needed.
    Dp = _round_up(D, 128)
    if Dp != D:
        x = jnp.pad(x, ((0, 0), (0, 0), (0, Dp - D)))
        wl = jnp.pad(wl, ((0, 0), (0, Dp - D)))
        if has_right:
            wr = jnp.pad(wr, ((0, 0), (0, Dp - D)))

    left_pad = (lorder - 1) * lstride
    right_pad = rorder * rstride
    la = _round_up(left_pad, 8)          # 8-aligned slot for x inside the scratch
    Ts = la + T + right_pad              # scratch time extent

    # Channel tile: largest multiple of 128 that divides Dp and keeps the
    # per-step footprint (double-buffered in/out + scratch) well under the
    # 32 MiB default scoped-VMEM limit on every TPU generation (incl. v7x).
    bytes_per_elem = x.dtype.itemsize
    budget = 20 * 1024 * 1024
    td = 128
    for cand in (512, 384, 256, 128):
        if Dp % cand == 0 and (4 * T + Ts) * cand * bytes_per_elem <= budget:
            td = cand
            break

    grid = (B, Dp // td)

    in_specs = [
        pl.BlockSpec((1, T, td), lambda b, c: (b, 0, c)),
        pl.BlockSpec((lorder, td), lambda b, c: (0, c)),
    ]
    args = [x, wl]
    if has_right:
        in_specs.append(pl.BlockSpec((rorder, td), lambda b, c: (0, c)))
        args.append(wr)

    kernel = functools.partial(
        _fsmn_kernel,
        T=T, lorder=lorder, rorder=rorder,
        lstride=lstride, rstride=rstride,
        la=la, right_pad=right_pad, has_right=has_right)

    out = pl.pallas_call(
        kernel,
        out_shape=jax.ShapeDtypeStruct((B, T, Dp), x.dtype),
        grid_spec=pltpu.PrefetchScalarGridSpec(
            num_scalar_prefetch=0,
            grid=grid,
            in_specs=in_specs,
            out_specs=pl.BlockSpec((1, T, td), lambda b, c: (b, 0, c)),
            scratch_shapes=[pltpu.VMEM((Ts, td), x.dtype)],
        ),
        compiler_params=pltpu.CompilerParams(
            dimension_semantics=("parallel", "parallel")),
    )(*args)

    if Dp != D:
        out = out[:, :, :D]
    return out


def fsmn_reference(x, wl, wr, *, lstride, rstride):
    """Pure-JAX reference matching the PyTorch Fsmn.forward semantics."""
    B, T, D = x.shape
    lorder, rorder = wl.shape[0], wr.shape[0]
    left_pad = (lorder - 1) * lstride
    right_pad = rorder * rstride
    xpad = jnp.pad(x, ((0, 0), (left_pad, right_pad), (0, 0)))
    out = x.astype(jnp.float32)
    for k in range(lorder):
        out = out + wl[k][None, None, :] * xpad[:, k * lstride:k * lstride + T, :]
    for k in range(rorder):
        off = left_pad + (k + 1) * rstride
        out = out + wr[k][None, None, :] * xpad[:, off:off + T, :]
    return out.astype(x.dtype)


if __name__ == "__main__":
    # Module config (small, consistent with Fsmn(input_dim=D, output_dim=D, ...)).
    B, T, D = 2, 16, 32
    lorder, rorder = 3, 2
    lstride, rstride = 2, 1

    key = jax.random.PRNGKey(0)
    kx, kl, kr = jax.random.split(key, 3)
    x = jax.random.normal(kx, (B, T, D), dtype=jnp.float32)

    # wl[k, d] corresponds to conv_left.weight[d, 0, k, 0]  (shape (D, 1, lorder, 1))
    # wr[k, d] corresponds to conv_right.weight[d, 0, k, 0] (shape (D, 1, rorder, 1))
    wl = 0.1 * jax.random.normal(kl, (lorder, D), dtype=jnp.float32)
    wr = 0.1 * jax.random.normal(kr, (rorder, D), dtype=jnp.float32)

    # Case 1: both causal and anti-causal filters (conv_right is not None).
    out = fsmn_forward(x, wl, wr, lstride=lstride, rstride=rstride)
    out = jax.block_until_ready(out)
    ref = fsmn_reference(x, wl, wr, lstride=lstride, rstride=rstride)
    assert out.shape == (B, T, D) and out.dtype == x.dtype
    assert jnp.allclose(out, ref, atol=1e-5, rtol=1e-5), "Pallas kernel mismatch (rorder>0)"

    # Case 2: rorder == 0 (conv_right is None path).
    wr0 = jnp.zeros((0, D), dtype=jnp.float32)
    out0 = fsmn_forward(x, wl, wr0, lstride=lstride, rstride=rstride)
    out0 = jax.block_until_ready(out0)
    ref0 = fsmn_reference(x, wl, wr0, lstride=lstride, rstride=rstride)
    assert jnp.allclose(out0, ref0, atol=1e-5, rtol=1e-5), "Pallas kernel mismatch (rorder==0)"

    print("KERNEL_OK")
</pallas_src>

<mosaic_0001>
module attributes {stable_mosaic.version = 11 : i64} {
  func.func @_fsmn_kernel(%arg0: i32, %arg1: i32, %arg2: memref<1x16x128xf32, #tpu.memory_space<vmem>>, %arg3: memref<3x128xf32, #tpu.memory_space<vmem>>, %arg4: memref<2x128xf32, #tpu.memory_space<vmem>>, %arg5: memref<1x16x128xf32, #tpu.memory_space<vmem>>, %arg6: memref<26x128xf32, #tpu.memory_space<vmem>>) attributes {dimension_semantics = [#tpu.dimension_semantics<parallel>, #tpu.dimension_semantics<parallel>], iteration_bounds = array<i64: 2, 1>, scalar_prefetch = 0 : i64, scratch_operands = 1 : i64, tpu.core_type = #tpu.core_type<tc>, window_params = [{transform_indices = @transform_0, window_bounds = array<i64: 1, 16, 128>}, {transform_indices = @transform_1, window_bounds = array<i64: 3, 128>}, {transform_indices = @transform_2, window_bounds = array<i64: 2, 128>}, {transform_indices = @transform_3, window_bounds = array<i64: 1, 16, 128>}]} {
    %cst = arith.constant 0.000000e+00 : f32
    %0 = vector.broadcast %cst : f32 to vector<8x128xf32>
    %c0 = arith.constant 0 : index
    %c0_0 = arith.constant 0 : index
    %1 = vector.load %arg6[%c0, %c0_0] : memref<26x128xf32, #tpu.memory_space<vmem>>, vector<8x128xf32>
    tpu.vector_store %arg6[%c0, %c0_0], %0 {strides = array<i32>} : memref<26x128xf32, #tpu.memory_space<vmem>>, vector<8x128xf32>,
    %c0_1 = arith.constant 0 : index
    %c0_2 = arith.constant 0 : index
    %c0_3 = arith.constant 0 : index
    %2 = vector.load %arg2[%c0_1, %c0_2, %c0_3] : memref<1x16x128xf32, #tpu.memory_space<vmem>>, vector<1x16x128xf32>
    %3 = vector.shape_cast %2 : vector<1x16x128xf32> to vector<16x128xf32>
    %c8 = arith.constant 8 : index
    %c0_4 = arith.constant 0 : index
    %4 = vector.load %arg6[%c8, %c0_4] : memref<26x128xf32, #tpu.memory_space<vmem>>, vector<16x128xf32>
    tpu.vector_store %arg6[%c8, %c0_4], %3 {strides = array<i32>} : memref<26x128xf32, #tpu.memory_space<vmem>>, vector<16x128xf32>,
    %cst_5 = arith.constant 0.000000e+00 : f32
    %5 = vector.broadcast %cst_5 : f32 to vector<2x128xf32>
    %c24 = arith.constant 24 : index
    %c0_6 = arith.constant 0 : index
    %6 = vector.load %arg6[%c24, %c0_6] : memref<26x128xf32, #tpu.memory_space<vmem>>, vector<2x128xf32>
    tpu.vector_store %arg6[%c24, %c0_6], %5 {strides = array<i32>} : memref<26x128xf32, #tpu.memory_space<vmem>>, vector<2x128xf32>,
    %c0_7 = arith.constant 0 : index
    %c0_8 = arith.constant 0 : index
    %7 = vector.load %arg3[%c0_7, %c0_8] : memref<3x128xf32, #tpu.memory_space<vmem>>, vector<3x128xf32>
    %c8_9 = arith.constant 8 : index
    %c0_10 = arith.constant 0 : index
    %8 = vector.load %arg6[%c8_9, %c0_10] : memref<26x128xf32, #tpu.memory_space<vmem>>, vector<16x128xf32>
    %9 = vector.extract_strided_slice %7 {offsets = [2, 0], sizes = [1, 128], strides = [1, 1]} : vector<3x128xf32> to vector<1x128xf32>
    %10 = vector.shape_cast %9 : vector<1x128xf32> to vector<128xf32>
    %11 = vector.shape_cast %10 : vector<128xf32> to vector<1x128xf32>
    %cst_11 = arith.constant 1.000000e+00 : f32
    %12 = vector.broadcast %cst_11 : f32 to vector<1x128xf32>
    %13 = arith.addf %12, %11 : vector<1x128xf32>
    %14 = vector.broadcast %13 : vector<1x128xf32> to vector<16x128xf32>
    %15 = arith.mulf %14, %8 : vector<16x128xf32>
    %16 = vector.extract_strided_slice %7 {offsets = [0, 0], sizes = [1, 128], strides = [1, 1]} : vector<3x128xf32> to vector<1x128xf32>
    %17 = vector.shape_cast %16 : vector<1x128xf32> to vector<128xf32>
    %18 = vector.shape_cast %17 : vector<128xf32> to vector<1x128xf32>
    %c4 = arith.constant 4 : index
    %c0_12 = arith.constant 0 : index
    %19 = vector.load %arg6[%c4, %c0_12] : memref<26x128xf32, #tpu.memory_space<vmem>>, vector<16x128xf32>
    %20 = vector.broadcast %18 : vector<1x128xf32> to vector<16x128xf32>
    %21 = arith.mulf %20, %19 : vector<16x128xf32>
    %22 = arith.addf %15, %21 : vector<16x128xf32>
    %23 = vector.extract_strided_slice %7 {offsets = [1, 0], sizes = [1, 128], strides = [1, 1]} : vector<3x128xf32> to vector<1x128xf32>
    %24 = vector.shape_cast %23 : vector<1x128xf32> to vector<128xf32>
    %25 = vector.shape_cast %24 : vector<128xf32> to vector<1x128xf32>
    %c6 = arith.constant 6 : index
    %c0_13 = arith.constant 0 : index
    %26 = vector.load %arg6[%c6, %c0_13] : memref<26x128xf32, #tpu.memory_space<vmem>>, vector<16x128xf32>
    %27 = vector.broadcast %25 : vector<1x128xf32> to vector<16x128xf32>
    %28 = arith.mulf %27, %26 : vector<16x128xf32>
    %29 = arith.addf %22, %28 : vector<16x128xf32>
    %c0_14 = arith.constant 0 : index
    %c0_15 = arith.constant 0 : index
    %30 = vector.load %arg4[%c0_14, %c0_15] : memref<2x128xf32, #tpu.memory_space<vmem>>, vector<2x128xf32>
    %31 = vector.extract_strided_slice %30 {offsets = [0, 0], sizes = [1, 128], strides = [1, 1]} : vector<2x128xf32> to vector<1x128xf32>
    %32 = vector.shape_cast %31 : vector<1x128xf32> to vector<128xf32>
    %33 = vector.shape_cast %32 : vector<128xf32> to vector<1x128xf32>
    %c9 = arith.constant 9 : index
    %c0_16 = arith.constant 0 : index
    %34 = vector.load %arg6[%c9, %c0_16] : memref<26x128xf32, #tpu.memory_space<vmem>>, vector<16x128xf32>
    %35 = vector.broadcast %33 : vector<1x128xf32> to vector<16x128xf32>
    %36 = arith.mulf %35, %34 : vector<16x128xf32>
    %37 = arith.addf %29, %36 : vector<16x128xf32>
    %38 = vector.extract_strided_slice %30 {offsets = [1, 0], sizes = [1, 128], strides = [1, 1]} : vector<2x128xf32> to vector<1x128xf32>
    %39 = vector.shape_cast %38 : vector<1x128xf32> to vector<128xf32>
    %40 = vector.shape_cast %39 : vector<128xf32> to vector<1x128xf32>
    %c10 = arith.constant 10 : index
    %c0_17 = arith.constant 0 : index
    %41 = vector.load %arg6[%c10, %c0_17] : memref<26x128xf32, #tpu.memory_space<vmem>>, vector<16x128xf32>
    %42 = vector.broadcast %40 : vector<1x128xf32> to vector<16x128xf32>
    %43 = arith.mulf %42, %41 : vector<16x128xf32>
    %44 = arith.addf %37, %43 : vector<16x128xf32>
    %c0_18 = arith.constant 0 : index
    %c0_19 = arith.constant 0 : index
    %c0_20 = arith.constant 0 : index
    %45 = vector.load %arg5[%c0_18, %c0_19, %c0_20] : memref<1x16x128xf32, #tpu.memory_space<vmem>>, vector<1x16x128xf32>
    %46 = vector.shape_cast %45 : vector<1x16x128xf32> to vector<16x128xf32>
    %47 = vector.shape_cast %44 : vector<16x128xf32> to vector<1x16x128xf32>
    tpu.vector_store %arg5[%c0_18, %c0_19, %c0_20], %47 {strides = array<i32>} : memref<1x16x128xf32, #tpu.memory_space<vmem>>, vector<1x16x128xf32>,
    return
  }
  func.func @transform_0(%arg0: i32, %arg1: i32) -> (i32, i32, i32) {
    %c0_i32 = arith.constant 0 : i32
    %c0_i32_0 = arith.constant 0 : i32
    return %arg0, %c0_i32, %arg1 : i32, i32, i32
  }
  func.func @transform_1(%arg0: i32, %arg1: i32) -> (i32, i32) {
    %c0_i32 = arith.constant 0 : i32
    %c0_i32_0 = arith.constant 0 : i32
    return %c0_i32, %arg1 : i32, i32
  }
  func.func @transform_2(%arg0: i32, %arg1: i32) -> (i32, i32) {
    %c0_i32 = arith.constant 0 : i32
    %c0_i32_0 = arith.constant 0 : i32
    return %c0_i32, %arg1 : i32, i32
  }
  func.func @transform_3(%arg0: i32, %arg1: i32) -> (i32, i32, i32) {
    %c0_i32 = arith.constant 0 : i32
    %c0_i32_0 = arith.constant 0 : i32
    return %arg0, %c0_i32, %arg1 : i32, i32, i32
  }
}

</mosaic_0001>

<bundles_post_ra>
// kernel: tpu_custom_call.1
= control target key start
LH: loop header
LB: loop body
LE: loop exit
PB: predicated region body
PF: predicated region fallthrough
CT: control target
= control target key end

     0   :  { %s892_s0 = inlined_call_operand.hbm [shape: f32[2,16,128], index: 0, kind: input, shape index: {}]   ;;  %s893_s1 = inlined_call_operand.hbm [shape: f32[3,128], index: 1, kind: input, shape index: {}]   ;;  %s894_s2 = inlined_call_operand.hbm [shape: f32[2,128], index: 2, kind: input, shape index: {}]   ;;  %s895_s3 = inlined_call_operand.hbm [shape: f32[2,16,128], index: 3, kind: output, shape index: {}]  }
   0x1   :  { %896 = sst [smem:[#allocation13_spill]] %s893_s1 }
   0x2   :  { %8 = vsyncpa [#allocation4], 0 }
   0x3   :  { %10 = vsyncpa [#allocation4 + $0x1], 0 }
   0x4   :  { %11 = vsyncpa [#allocation7], 0 }
   0x5   :  { %12 = vsyncpa [#allocation5], 0 }
   0x6   :  { %14 = vsyncpa [#allocation5 + $0x1], 0  ;;  %s734_s12 = smov 0   ;;  %s736_s13 = smov 0  }
   0x7   :  { %s738_s14 = smov 0   ;;  %s740_s15 = smov 0  }
   0x8   :  { %s742_s16 = smov 0   ;;  %s744_s17 = smov 0  }
   0x9 LB: > { %s420_s18 = sadd.s32 4294967295, %s705_s17   ;;  %s421_s19 = sadd.s32 4294967294, %s705_s17   ;;  %s705_s17 = sphi %s744_s17, %s20_s17   ;;  %s701_s16 = sphi %s742_s16, %s909_s16   ;;  %s697_s15 = sphi %s740_s15, %s908_s15   ;;  %s693_s14 = sphi %s738_s14, %s907_s14   ;;  %s689_s13 = sphi %s736_s13, %s906_s13   ;;  %s685_s12 = sphi %s734_s12, %s905_s12  }
   0xa   : > { %s41_s20 = sadd.s32 1, %s693_s14  ;;  %p48_p0 = scmp.ne.s32.totalorder %s693_s14, %s689_s13 }
   0xb   : > { %p49_p1 = scmp.eq.s32.totalorder %s705_s17, 0  ;;  %p54_p2 = scmp.ne.s32.totalorder %s689_s13, %s685_s12 }
   0xc   : > { %p772_p3 = scmp.eq.s32.totalorder %s420_s18, 0  ;;  %p132_p4 = scmp.eq.s32.totalorder %s420_s18, 1 }
   0xd   : > { %p776_p5 = por %p49_p1, %p48_p0  ;;  %p138_p6 = scmp.eq.s32.totalorder %s421_s19, 1 }
   0xe   : > { %p782_p7 = por %p772_p3, %p54_p2  ;;  %p786_p8 = por %p132_p4, %p48_p0 }
   0xf   : > { %p790_p9 = por %p138_p6, %p54_p2  ;;  %p422_p10 = scmp.ge.s32.totalorder %s705_s17, 1 }
  0x10   : > { %p145_p11 = scmp.lt.s32.totalorder %s705_s17, 3  ;;  %s902_s1 = sld [smem:[#allocation13_spill]] }
  0x11   : > { %s707_s30 = smov [#allocation6]   ;;  %p425_p13 = scmp.ge.s32.totalorder %s705_s17, 2 }
  0x12   : > { %p799_p12 = pnand %p422_p10, %p145_p11  ;;  %s161_s4 = sshll.u32 %s707_s30, 4  ;;  %s162_s4 = int_to_ptr.vmem [resolvable:$true] %s161_s4 }
  0x13   : > { %p470_p1 = scmp.lt.s32.totalorder %s705_s17, 2  ;;  %s173_s7 = sshll.u32 %s894_s2, 4  ;;  %s174_s7 = int_to_ptr.hbm [resolvable:$true] %s173_s7 }
  0x14   : > { %p453_p0 = pneg %p799_p12  ;;  %s708_s9 = smov [#allocation8]  }
  0x15   : > { %p814_p4 = pnand %p470_p1, %p776_p5  ;;  %s175_s10 = sshll.u32 %s708_s9, 4  ;;  %s176_s10 = int_to_ptr.vmem [resolvable:$true] %s175_s10 }
  0x16   : > { %s159_s28 = sshll.u32 %s902_s1, 4  ;;  %p454_p2 = pnand %p453_p0, %p772_p3  ;;  %s160_s28 = int_to_ptr.hbm [resolvable:$true] %s159_s28 }
  0x17   : > { %s186_s11 = sand.u32 1, %s693_s14   ;;  %s32_s18 = sadd.s32 1, %s701_s16 }
  0x18   : > { %456 = dma.hbm_to_vmem [thread:$0]  (!%p454_p2), %s160_s28, 64, %s162_s4, [#allocation7]  }
  0x19   : > { %459 = dma.hbm_to_vmem [thread:$0]  (!%p454_p2), %s174_s7, 32, %s176_s10, [#allocation7]  }
  0x1a   : > { %s426_s19 = sshll.u32 %s186_s11, 4  ;;  %p34_p6 = scmp.ge.s32.totalorder %s32_s18, 2 }
  0x1b   : > { %s439_s26 = sshll.u32 %s701_s16, 4  ;;  %s190_s27 = scalar_lea.vmem [#allocation3], %s426_s19 }
  0x1c   : > { %s199_s22 = sshll.u32 %s190_s27, 4  ;;  %s911_s18 = smov (%p34_p6, %s32_s18), 0  ;;  %s200_s22 = int_to_ptr.vmem [resolvable:$true] %s199_s22 }
  0x1d   : > { %s196_s6 = scalar_lea.hbm %s892_s0, %s439_s26  ;;  %s36_s28 = ssub.s32 %s701_s16, %s911_s18 }
  0x1e   : > { %s197_s4 = sshll.u32 %s196_s6, 4  ;;  %p39_p5 = scmp.eq.s32.totalorder %s36_s28, 0  ;;  %s198_s4 = int_to_ptr.hbm [resolvable:$true] %s197_s4 }
  0x1f   : > { %s187_s9 = scalar_lea.sflag [#allocation4], %s186_s11  ;;  %s709_s10 = smov 128  }
  0x20   : > { %s831_s7 = scalar_select %p39_p5, %s693_s14, %s41_s20  }
  0x21   : > { %s710_s1 = smov 8   ;;  %211 = sbr.rel (%p799_p12) target bundleno = 68 (0x44), region = 32 }
  0x22   : > { %463 = dma.hbm_to_vmem [thread:$0]  (!%p814_p4), %s198_s4, 256, %s200_s22, %s187_s9, %s709_s10, %s709_s10, %s710_s1  }
  0x23   : > { %s838_s19 = sand.u32 (!%p799_p12), 1, %s689_s13  }
  0x24   : > { %s430_s26 = sshll.u32 (!%p799_p12), %s838_s19, 4  ;;  %s214_s27 = scalar_lea.sflag (!%p799_p12), [#allocation4], %s838_s19 }
  0x25   : > { %s217_s20 = scalar_lea.vmem (!%p799_p12), [#allocation3], %s430_s26 }
  0x26   : > { %672 = dma.done.wait (%p782_p7), %s214_s27, 256  }
  0x27   : > { %674 = vsyncadd (%p782_p7), %s214_s27, 4294967040 }
  0x28   : > { %676 = dma.done.wait (%p772_p3), [#allocation7], 96  }
  0x29   : > { %678 = vsyncadd (%p772_p3), [#allocation7], 4294967200  ;;  %v711_v0 = vmov 0.0   ;;  %v252_v1 = vld [vmem:[%s217_s20] sm:$0xff]  ;;  %v253_v2 = vld [vmem:[%s217_s20 + $0x8] sm:$0xff]  ;;  %s440_s1 = sshll.u32 %s697_s15, 4 }
  0x2a   : > { %251 = vst [vmem:[#allocation2] sm:$0xff] %v711_v0  ;;  %v257_v3 = vld [vmem:[#allocation6] sm:$0x7]  ;;  %v278_v7 = vld [vmem:[#allocation8] sm:$0x3]  ;;  %s308_s29 = scalar_lea.hbm %s895_s3, %s440_s1  ;;  %s250_s15 = scalar_lea.vmem [#allocation9], %s430_s26 }
  0x2b   : > { %256 = vst [vmem:[#allocation2 + $0x18] sm:$0x3] %v711_v0  ;;  %v260_v4 = vadd.f32 1.0, %v257_v3  ;;  %v266_v6 = vperm.slane %v257_v3, 0  ;;  %v273_v9 = vperm.slane %v257_v3, 1  ;;  %v281_v14 = vperm.slane %v278_v7, 0 }
  0x2c   : > { %254 = vst [vmem:[#allocation2 + $0x8] sm:$0xff] %v252_v1  ;;  %v288_v21 = vperm.slane %v278_v7, 1  ;;  %s309_s8 = sshll.u32 %s250_s15, 4  ;;  %s311_s11 = sshll.u32 %s308_s29, 4  ;;  %s310_s8 = int_to_ptr.vmem [resolvable:$true] %s309_s8  ;;  %s312_s11 = int_to_ptr.hbm [resolvable:$true] %s311_s11 }
  0x2d   : > { %255 = vst [vmem:[#allocation2 + $0x10] sm:$0xff] %v253_v2  ;;  %v261_v5 = vperm.slane %v260_v4, 2  ;;  %s296_s22 = scalar_lea.sflag [#allocation5], %s838_s19  ;;  %s633_s30 = sshra.s32 %s312_s11, 4  ;;  %s634_s30 = int_to_ptr.hbm [resolvable:$true] %s633_s30 }
  0x2e   : > { %s635_s5 = scalar_lea.hbm %s634_s30, 16  ;;  %s639_s4 = scalar_lea.hbm %s895_s3, 32 }
  0x2f   : > { %v262_v8 = vmul.f32 %v261_v5, %v252_v1  ;;  %v263_v12 = vmul.f32 %v261_v5, %v253_v2  ;;  %p636_p3 = scmp.ne.s32.totalorder %s634_s30, %s635_s5  ;;  %p640_p11 = scmp.lt.s32.totalorder %s634_s30, %s895_s3 }
  0x30   : > { %p641_p12 = scmp.lt.s32.totalorder %s639_s4, %s635_s5 }
  0x31   : > { %p637_p7 = pnand %p636_p3, %p786_p8 }
  0x32   : > { %p642_p0 = por %p641_p12, %p640_p11 }
  0x33   : > { %v264_v10 = vld [vmem:[#allocation2 + $0x4] sm:$0xff]  ;;  %p638_p10 = pneg %p637_p7 }
  0x34   : > { %v271_v11 = vld [vmem:[#allocation2 + $0x6] sm:$0xff]  ;;  %v267_v13 = vmul.f32 %v266_v6, %v264_v10  ;;  %v272_v18 = vld [vmem:[#allocation2 + $0xe] sm:$0xff] }
  0x35   : > { %v265_v15 = vld [vmem:[#allocation2 + $0xc] sm:$0xff]  ;;  %v274_v20 = vmul.f32 %v273_v9, %v271_v11  ;;  %v275_v25 = vmul.f32 %v273_v9, %v272_v18  ;;  %p643_p1 = pnand %p642_p0, %p638_p10 }
  0x36   : > { %v279_v16 = vld [vmem:[#allocation2 + $0x9] sm:$0xff]  ;;  %v268_v17 = vmul.f32 %v266_v6, %v265_v15  ;;  %v269_v19 = vadd.f32 %v267_v13, %v262_v8  ;;  %v280_v22 = vld [vmem:[#allocation2 + $0x11] sm:$0xff] }
  0x37   : > { %v286_v23 = vld [vmem:[#allocation2 + $0xa] sm:$0xff]  ;;  %v282_v27 = vmul.f32 %v281_v14, %v279_v16  ;;  %v287_v28 = vld [vmem:[#allocation2 + $0x12] sm:$0xff]  ;;  %v283_v30 = vmul.f32 %v281_v14, %v280_v22 }
  0x38   : > { %v270_v24 = vadd.f32 %v268_v17, %v263_v12  ;;  %v276_v26 = vadd.f32 %v274_v20, %v269_v19  ;;  %v289_v32 = vmul.f32 %v288_v21, %v286_v23  ;;  %v290_v34 = vmul.f32 %v288_v21, %v287_v28 }
  0x3a   : > { %v277_v29 = vadd.f32 %v275_v25, %v270_v24  ;;  %v284_v31 = vadd.f32 %v282_v27, %v276_v26 }
  0x3c   : > { %v285_v33 = vadd.f32 %v283_v30, %v277_v29  ;;  %v291_v35 = vadd.f32 %v289_v32, %v284_v31 }
  0x3e   : > { %v292_v36 = vadd.f32 %v290_v34, %v285_v33  ;;  %293 = vst [vmem:[%s250_s15] sm:$0xff] %v291_v35 }
  0x40   : > { %294 = vst [vmem:[%s250_s15 + $0x8] sm:$0xff] %v292_v36 }
  0x41   : > { %646 = shalt.err (!%p643_p1)
}
  0x42   : > { %s712_s19 = smov 128   ;;  %s713_s26 = smov 8  }
  0x43   : > { %451 = dma.vmem_to_hbm [thread:$0]  (%p786_p8), %s310_s8, 256, %s312_s11, %s296_s22, %s712_s19, %s712_s19, %s713_s26  }
  0x44 PF: > { %s326_s27 = sand.u32 1, %s685_s12   ;;  %p465_p2 = pnand %p425_p13, %p790_p9 }
  0x45   : > { %s327_s20 = scalar_lea.sflag [#allocation5], %s326_s27 }
  0x46   : > { %p466_p4 = pneg %p465_p2 }
  0x48   : > { %680 = dma.done.wait (%p466_p4), %s327_s20, 256  }
  0x49   : > { %682 = vsyncadd (%p466_p4), %s327_s20, 4294967040  ;;  %s20_s17 = sadd.s32 1, %s705_s17   ;;  %s905_s12 = smov %s689_s13 }
  0x4a   : > { %p17_p6 = scmp.ge.s32.totalorder %s20_s17, 4   ;;  %s906_s13 = smov %s693_s14 }
  0x4b   : > { %s907_s14 = smov %s831_s7  ;;  %s908_s15 = smov %s701_s16 }
  0x4c   : > { %s909_s16 = smov %s911_s18  ;;  %19 = sbr.rel (!%p17_p6) target bundleno = 9 (0x9), region = 87 }
  0x51   :  { %333 = vsyncpa [#allocation4], 1 }
  0x52   :  { %335 = vsyncpa [#allocation4 + $0x1], 1 }
  0x53   :  { %336 = vsyncpa [#allocation7], 1 }
  0x54   :  { %337 = vsyncpa [#allocation5], 1 }
  0x55   :  { %339 = vsyncpa [#allocation5 + $0x1], 1 }

</bundles_post_ra>
